<compile_context>
chip_gen: v5e
topology: v5e:2x2
jax: 0.10.0
libtpu: 0.0.40
codegen_flags: <defaults>
</compile_context>

<pallas_src>
import functools

import numpy as np
import jax
import jax.numpy as jnp
from jax.experimental import pallas as pl
from jax.experimental.pallas import tpu as pltpu

_EPS_F32 = float(jnp.finfo(jnp.float32).eps)  # matches torch.finfo(float32).eps


# ---------------------------------------------------------------------------
# Pallas kernels (elementwise hot path)
# ---------------------------------------------------------------------------
def _log_mixup_exp_kernel(alpha_ref, x_ref, z_ref, o_ref):
    # alpha_ref: (1,) f32 scalar-prefetch operand (SMEM).
    # log(a * exp(x) + (1 - a) * exp(z) + eps); the caller passes a = 1 - alpha
    # so this matches PyTorch log_mixup_exp(x, z, 1 - alpha).
    a = alpha_ref[0]
    xa = jnp.exp(x_ref[...].astype(jnp.float32))
    xb = jnp.exp(z_ref[...].astype(jnp.float32))
    o_ref[...] = jnp.log(a * xa + (1.0 - a) * xb + _EPS_F32).astype(o_ref.dtype)


def _linear_mixup_kernel(alpha_ref, x_ref, z_ref, o_ref):
    # mixed = alpha * z + (1 - alpha) * x   (log_mixup_exp=False branch)
    a = alpha_ref[0]
    o_ref[...] = (a * z_ref[...].astype(jnp.float32)
                  + (1.0 - a) * x_ref[...].astype(jnp.float32)).astype(o_ref.dtype)


_KERNELS = {"log": _log_mixup_exp_kernel, "linear": _linear_mixup_kernel}


# ---------------------------------------------------------------------------
# Generation-aware device profile & block planning
# ---------------------------------------------------------------------------
@functools.lru_cache(maxsize=None)
def _device_profile():
    """(pipeline_bytes, vmem_limit, prefer_split) sized per TPU generation."""
    vmem_bytes = None
    try:
        info = pltpu.get_tpu_info()
        vmem_bytes = int(getattr(info, "vmem_capacity_bytes", 0)) or None
    except Exception:
        vmem_bytes = None

    if vmem_bytes is None:
        # Unknown chip: conservative sizing that fits every generation
        # (v7x has only 64 MiB physical VMEM per TensorCore).
        return {"pipeline_bytes": 24 << 20, "vmem_limit": 48 << 20,
                "prefer_split": False}
    if vmem_bytes <= (96 << 20):
        # v7x-like: 64 MiB/TC, 2 TensorCores. Keep >= 2 grid steps so the
        # "parallel" axis can shard across both cores (EUP is near-co-critical
        # with HBM for the 3-transcendental log kernel there).
        return {"pipeline_bytes": 24 << 20, "vmem_limit": 48 << 20,
                "prefer_split": True}
    # v5e / v6e: single TensorCore, 128 MiB VMEM -> fewest, biggest blocks
    # (grid is a serial loop; extra steps are pure overhead on a mem-bound op).
    return {"pipeline_bytes": 72 << 20, "vmem_limit": 96 << 20,
            "prefer_split": False}


def _round_up(v, m):
    return -(-v // m) * m


def _plan_blocks(rows, cols, in_itemsize, out_itemsize, profile):
    """Pick (block_rows, block_cols, grid) for a (rows, cols) elementwise op."""
    # Double-buffered VMEM bytes per block element: 2 inputs + 1 output.
    per_elem = 2 * (2 * in_itemsize + out_itemsize)
    max_elems = max(profile["pipeline_bytes"] // per_elem, 8 * 128)

    if rows * cols <= max_elems:
        # Whole array fits in one block.
        block_rows, block_cols = rows, cols
        if profile["prefer_split"] and rows >= 16:
            # v7x: force >= 2 row blocks so megacore can split across both TCs.
            block_rows = _round_up((rows + 1) // 2, 8)
    elif 8 * cols <= max_elems:
        # Full-width (lane-dense, unmasked) row blocks; ragged tail masked.
        block_cols = cols
        block_rows = max(((max_elems // cols) // 8) * 8, 8)
    else:
        # Huge last dim: block along lanes too (multiple of 128 -> legal).
        block_rows = rows if rows < 8 else 8
        block_cols = max(((max_elems // max(block_rows, 1)) // 128) * 128, 128)

    grid = (pl.cdiv(rows, block_rows), pl.cdiv(cols, block_cols))
    return block_rows, block_cols, grid


# ---------------------------------------------------------------------------
# Build one jitted (reshape -> pallas_call -> reshape) function per layout
# ---------------------------------------------------------------------------
@functools.lru_cache(maxsize=None)
def _build_mix_fn(kind, shape, x_dtype_name, z_dtype_name, out_dtype_name):
    shape = tuple(int(d) for d in shape)
    x_dtype = jnp.dtype(x_dtype_name)
    z_dtype = jnp.dtype(z_dtype_name)
    out_dtype = jnp.dtype(out_dtype_name)

    cols = int(shape[-1]) if len(shape) >= 1 else 1
    rows = 1
    for d in shape[:-1]:
        rows *= int(d)
    rows, cols = max(rows, 1), max(cols, 1)

    profile = _device_profile()
    in_itemsize = max(x_dtype.itemsize, z_dtype.itemsize)
    block_rows, block_cols, grid = _plan_blocks(
        rows, cols, in_itemsize, out_dtype.itemsize, profile)

    n = rows * cols
    cost = pl.CostEstimate(
        flops=5 * n,
        transcendentals=(3 * n if kind == "log" else 0),
        bytes_accessed=(x_dtype.itemsize + z_dtype.itemsize + out_dtype.itemsize) * n,
    )

    grid_spec = pltpu.PrefetchScalarGridSpec(
        num_scalar_prefetch=1,      # alpha: (1,) f32 in SMEM
        grid=grid,
        in_specs=[
            pl.BlockSpec((block_rows, block_cols), lambda i, j, alpha: (i, j)),
            pl.BlockSpec((block_rows, block_cols), lambda i, j, alpha: (i, j)),
        ],
        out_specs=pl.BlockSpec((block_rows, block_cols), lambda i, j, alpha: (i, j)),
    )

    call = pl.pallas_call(
        _KERNELS[kind],
        out_shape=jax.ShapeDtypeStruct((rows, cols), out_dtype),
        grid_spec=grid_spec,
        compiler_params=pltpu.CompilerParams(
            dimension_semantics=("parallel", "parallel"),
            vmem_limit_bytes=profile["vmem_limit"],
        ),
        cost_estimate=cost,
    )

    def fn(alpha_arr, x, z):
        # Leading-dim collapse only (layout-preserving, no pad / no slice).
        x2 = x.reshape(rows, cols)
        z2 = z.reshape(rows, cols)
        return call(alpha_arr, x2, z2).reshape(shape)

    return jax.jit(fn)


def _elementwise_mix(kind, x, z, alpha, out_dtype=jnp.float32):
    """Elementwise 2-array + scalar mix over arrays of identical shape."""
    x = jnp.asarray(x)
    z = jnp.asarray(z)
    assert x.shape == z.shape, "mixup operands must have identical shapes"
    if x.size == 0:
        return x.astype(out_dtype)
    fn = _build_mix_fn(kind, tuple(x.shape), str(x.dtype), str(z.dtype),
                       str(jnp.dtype(out_dtype)))
    alpha_arr = jnp.asarray([alpha], dtype=jnp.float32)
    return fn(alpha_arr, x, z)


def log_mixup_exp_pallas(x, z, alpha, out_dtype=jnp.float32):
    return _elementwise_mix("log", x, z, alpha, out_dtype)


def linear_mixup_pallas(x, z, alpha, out_dtype=jnp.float32):
    return _elementwise_mix("linear", x, z, alpha, out_dtype)


# ---------------------------------------------------------------------------
# Module equivalent (stateful memory bank + host RNG = glue, not kernel work)
# ---------------------------------------------------------------------------
class MixupData:
    """JAX/Pallas port of Mixupdata (BYOL-A mixup). No learnable parameters.

    `out_dtype` defaults to float32 for PyTorch parity; pass jnp.bfloat16 to
    halve output HBM traffic when feeding a bf16 model.
    """

    def __init__(self, ratio=0.2, n_memory=2048, log_mixup_exp=True, seed=0,
                 out_dtype=jnp.float32):
        self.ratio = ratio
        self.n = n_memory
        self.log_mixup_exp = log_mixup_exp
        self.out_dtype = out_dtype
        self.memory_bank = []
        # TODO(synk): host-side numpy RNG + Python-list FIFO have no Pallas
        # equivalent (stateful, data-independent control flow); kept as glue.
        self._rng = np.random.RandomState(seed)

    def __call__(self, x):
        alpha = self.ratio * float(self._rng.random())
        if self.memory_bank:
            z = self.memory_bank[int(self._rng.randint(len(self.memory_bank)))]
            if self.log_mixup_exp:
                # PyTorch: log_mixup_exp(x, z, 1 - alpha)
                mixed = log_mixup_exp_pallas(x, z, 1.0 - alpha,
                                             out_dtype=self.out_dtype)
            else:
                # PyTorch: alpha * z + (1 - alpha) * x
                mixed = linear_mixup_pallas(x, z, alpha,
                                            out_dtype=self.out_dtype)
        else:
            mixed = jnp.asarray(x, dtype=self.out_dtype)
        self.memory_bank = (self.memory_bank + [x])[-self.n:]
        return mixed


Mixupdata = MixupData  # name alias matching the PyTorch class


# ---------------------------------------------------------------------------
# Reference (plain JAX) for verification
# ---------------------------------------------------------------------------
def _log_mixup_exp_ref(xa, xb, alpha):
    x = alpha * jnp.exp(xa.astype(jnp.float32)) \
        + (1.0 - alpha) * jnp.exp(xb.astype(jnp.float32))
    return jnp.log(x + _EPS_F32)


if __name__ == "__main__":
    key = jax.random.PRNGKey(0)
    k1, k2, k3, k4 = jax.random.split(key, 4)

    # Small spectrogram-like inputs: (channels, freq, time) = (1, 64, 128)
    x1 = jax.random.normal(k1, (1, 64, 128), dtype=jnp.float32)
    x2 = jax.random.normal(k2, (1, 64, 128), dtype=jnp.float32)

    mix = MixupData(ratio=0.2, n_memory=2048, log_mixup_exp=True, seed=0)

    out1 = mix(x1)                 # memory bank empty -> passthrough
    out2 = mix(x2)                 # mixes x2 with banked x1 via the Pallas kernel
    out2 = jax.block_until_ready(out2)

    # Reconstruct the alphas the module drew (same deterministic RNG sequence).
    rng_check = np.random.RandomState(0)
    _alpha1 = 0.2 * float(rng_check.random())          # call 1 (mix unused)
    alpha2 = 0.2 * float(rng_check.random())           # call 2
    _idx = rng_check.randint(1)                        # bank index (always 0 here)
    ref2 = _log_mixup_exp_ref(x2, x1, 1.0 - alpha2)

    assert out1.dtype == jnp.float32 and out2.dtype == jnp.float32
    assert out2.shape == x2.shape
    np.testing.assert_allclose(np.asarray(out2), np.asarray(ref2),
                               rtol=1e-5, atol=1e-5)
    assert bool(jnp.all(jnp.isfinite(out2)))

    # Exercise the linear (log_mixup_exp=False) branch kernel as well.
    lin = jax.block_until_ready(linear_mixup_pallas(x2, x1, 0.25))
    ref_lin = 0.25 * x1 + 0.75 * x2
    np.testing.assert_allclose(np.asarray(lin), np.asarray(ref_lin),
                               rtol=1e-6, atol=1e-6)

    # Non-multiple-of-128 time dim + bf16 inputs: exercises the full-extent
    # last-dim block (no padding path) and the in-kernel dtype cast.
    xo = jax.random.normal(k3, (1, 64, 101), dtype=jnp.bfloat16)
    zo = jax.random.normal(k4, (1, 64, 101), dtype=jnp.bfloat16)
    oo = jax.block_until_ready(log_mixup_exp_pallas(xo, zo, 0.9))
    ro = _log_mixup_exp_ref(xo, zo, 0.9)
    assert oo.dtype == jnp.float32 and oo.shape == xo.shape
    np.testing.assert_allclose(np.asarray(oo), np.asarray(ro),
                               rtol=1e-5, atol=1e-5)

    print("KERNEL_OK")
</pallas_src>

<mosaic_0001>
module attributes {stable_mosaic.version = 11 : i64} {
  func.func @_log_mixup_exp_kernel(%arg0: i32, %arg1: i32, %arg2: memref<1xf32, #tpu.memory_space<smem>>, %arg3: memref<64x128xf32, #tpu.memory_space<vmem>>, %arg4: memref<64x128xf32, #tpu.memory_space<vmem>>, %arg5: memref<64x128xf32, #tpu.memory_space<vmem>>) attributes {dimension_semantics = [#tpu.dimension_semantics<parallel>, #tpu.dimension_semantics<parallel>], iteration_bounds = array<i64: 1, 1>, scalar_prefetch = 1 : i64, scratch_operands = 0 : i64, tpu.core_type = #tpu.core_type<tc>, window_params = [{transform_indices = @transform_0, window_bounds = array<i64: 64, 128>}, {transform_indices = @transform_1, window_bounds = array<i64: 64, 128>}, {transform_indices = @transform_2, window_bounds = array<i64: 64, 128>}]} {
    %c0 = arith.constant 0 : index
    %0 = memref.load %arg2[%c0] : memref<1xf32, #tpu.memory_space<smem>>
    %c0_0 = arith.constant 0 : index
    %c0_1 = arith.constant 0 : index
    %1 = vector.load %arg3[%c0_0, %c0_1] : memref<64x128xf32, #tpu.memory_space<vmem>>, vector<64x128xf32>
    %2 = math.exp %1 : vector<64x128xf32>
    %c0_2 = arith.constant 0 : index
    %c0_3 = arith.constant 0 : index
    %3 = vector.load %arg4[%c0_2, %c0_3] : memref<64x128xf32, #tpu.memory_space<vmem>>, vector<64x128xf32>
    %4 = math.exp %3 : vector<64x128xf32>
    %5 = vector.broadcast %0 : f32 to vector<64x128xf32>
    %6 = arith.mulf %5, %2 : vector<64x128xf32>
    %cst = arith.constant 1.000000e+00 : f32
    %7 = arith.subf %cst, %0 : f32
    %8 = vector.broadcast %7 : f32 to vector<64x128xf32>
    %9 = arith.mulf %8, %4 : vector<64x128xf32>
    %10 = arith.addf %6, %9 : vector<64x128xf32>
    %cst_4 = arith.constant 1.1920929E-7 : f32
    %11 = vector.broadcast %cst_4 : f32 to vector<64x128xf32>
    %12 = arith.addf %10, %11 : vector<64x128xf32>
    %13 = math.log %12 : vector<64x128xf32>
    %c0_5 = arith.constant 0 : index
    %c0_6 = arith.constant 0 : index
    %14 = vector.load %arg5[%c0_5, %c0_6] : memref<64x128xf32, #tpu.memory_space<vmem>>, vector<64x128xf32>
    tpu.vector_store %arg5[%c0_5, %c0_6], %13 {strides = array<i32>} : memref<64x128xf32, #tpu.memory_space<vmem>>, vector<64x128xf32>,
    return
  }
  func.func @transform_0(%arg0: i32, %arg1: i32, %arg2: memref<1xf32, #tpu.memory_space<smem>>) -> (i32, i32) {
    %c0_i32 = arith.constant 0 : i32
    return %arg0, %arg1 : i32, i32
  }
  func.func @transform_1(%arg0: i32, %arg1: i32, %arg2: memref<1xf32, #tpu.memory_space<smem>>) -> (i32, i32) {
    %c0_i32 = arith.constant 0 : i32
    return %arg0, %arg1 : i32, i32
  }
  func.func @transform_2(%arg0: i32, %arg1: i32, %arg2: memref<1xf32, #tpu.memory_space<smem>>) -> (i32, i32) {
    %c0_i32 = arith.constant 0 : i32
    return %arg0, %arg1 : i32, i32
  }
}

</mosaic_0001>

<bundles_post_ra>
// kernel: fn.1
= control target key start
LH: loop header
LB: loop body
LE: loop exit
PB: predicated region body
PF: predicated region fallthrough
CT: control target
= control target key end

     0   :  { %9 = vsyncpa [#allocation5], 0  ;;  %s374_s0 = inlined_call_operand.<no memory space> [shape: f32[1], index: 0, kind: input, shape index: {}]   ;;  %s375_s1 = inlined_call_operand.hbm [shape: f32[64,128], index: 1, kind: input, shape index: {}]   ;;  %s376_s2 = inlined_call_operand.hbm [shape: f32[64,128], index: 2, kind: input, shape index: {}]   ;;  %s377_s3 = inlined_call_operand.hbm [shape: f32[64,128], index: 3, kind: output, shape index: {}]  }
   0x1   :  { %10 = vsyncpa [#allocation8], 0 }
   0x2   :  { %11 = vsyncpa [#allocation6], 0  ;;  %s16_s14 = sshll.u32 %s375_s1, 4  ;;  %s305_s15 = smov [#allocation4]   ;;  %s17_s14 = int_to_ptr.hbm [resolvable:$true] %s16_s14 }
   0x3   :  { %s18_s16 = sshll.u32 %s305_s15, 4  ;;  %s29_s19 = sshll.u32 %s376_s2, 4  ;;  %s19_s16 = int_to_ptr.vmem [resolvable:$true] %s18_s16  ;;  %s30_s19 = int_to_ptr.hbm [resolvable:$true] %s29_s19 }
   0x4   :  { %s306_s20 = smov 128   ;;  %s307_s21 = smov 8  }
   0x5   :  { %24 = dma.hbm_to_vmem [thread:$0]  %s17_s14, 1024, %s19_s16, [#allocation5], %s306_s20, %s306_s20, %s307_s21  }
   0x6   :  { %s308_s22 = smov [#allocation7]  }
   0x7   :  { %s31_s23 = sshll.u32 %s308_s22, 4  ;;  %s32_s23 = int_to_ptr.vmem [resolvable:$true] %s31_s23 }
   0x8   :  { %37 = dma.hbm_to_vmem [thread:$0]  %s30_s19, 1024, %s32_s23, [#allocation8], %s306_s20, %s306_s20, %s307_s21  }
   0x9   :  { %299 = dma.done.wait [#allocation5], 1024  }
   0xa   :  { %300 = vsyncadd [#allocation5], 4294966272 }
   0xb   :  { %301 = dma.done.wait [#allocation8], 1024  }
   0xc   :  { %302 = vsyncadd [#allocation8], 4294966272  ;;  %v47_v0 = vld [vmem:[#allocation4] sm:$0xff]  ;;  %v48_v2 = vld [vmem:[#allocation4 + $0x8] sm:$0xff]  ;;  %s104_s24 = ssub.f32 1.0, %s374_s0  ;;  %v348_v19 = vstv %s374_s0  ;;  %s309_s0 = smov [#allocation9]  }
   0xd   :  { %v71_v1 = vld [vmem:[#allocation7] sm:$0xff]  ;;  %v55_v3 = vmul.f32 1.442695, %v47_v0  ;;  %v57_v5 = vmul.f32 1.442695, %v48_v2  ;;  %v72_v6 = vld [vmem:[#allocation7 + $0x8] sm:$0xff] }
   0xe   :  { %v79_v4 = vmul.f32 1.442695, %v71_v1  ;;  %v49_v7 = vld [vmem:[#allocation4 + $0x10] sm:$0xff]  ;;  %v81_v9 = vmul.f32 1.442695, %v72_v6  ;;  %v50_v12 = vld [vmem:[#allocation4 + $0x18] sm:$0xff]  ;;  %v350_v22 = vstv %s104_s24 }
   0xf   :  { %v73_v8 = vld [vmem:[#allocation7 + $0x10] sm:$0xff]  ;;  %179 = vpow2.f32 %v55_v3  ;;  %v59_v10 = vmul.f32 1.442695, %v49_v7  ;;  %v74_v13 = vld [vmem:[#allocation7 + $0x18] sm:$0xff]  ;;  %v51_v14 = vld [vmem:[#allocation4 + $0x20] sm:$0xff]  ;;  %s158_s27 = sshll.u32 %s309_s0, 4  ;;  %s159_s27 = int_to_ptr.vmem [resolvable:$true] %s158_s27 }
  0x10   :  { %181 = vpow2.f32 %v79_v4  ;;  %v83_v11 = vmul.f32 1.442695, %v73_v8  ;;  %v61_v15 = vmul.f32 1.442695, %v50_v12  ;;  %v85_v16 = vmul.f32 1.442695, %v74_v13 }
  0x11   :  { %183 = vpow2.f32 %v57_v5  ;;  %v75_v17 = vld [vmem:[#allocation7 + $0x20] sm:$0xff]  ;;  %v52_v18 = vld [vmem:[#allocation4 + $0x28] sm:$0xff]  ;;  %v63_v20 = vmul.f32 1.442695, %v51_v14  ;;  %v53_v24 = vld [vmem:[#allocation4 + $0x30] sm:$0xff]  ;;  %s160_s30 = sshll.u32 %s377_s3, 4  ;;  %s161_s30 = int_to_ptr.hbm [resolvable:$true] %s160_s30 }
  0x12   :  { %185 = vpow2.f32 %v81_v9  ;;  %v76_v21 = vld [vmem:[#allocation7 + $0x28] sm:$0xff]  ;;  %v87_v23 = vmul.f32 1.442695, %v75_v17  ;;  %v65_v26 = vmul.f32 1.442695, %v52_v18  ;;  %v77_v27 = vld [vmem:[#allocation7 + $0x30] sm:$0xff] }
  0x13   :  { %187 = vpow2.f32 %v59_v10  ;;  %v89_v30 = vmul.f32 1.442695, %v76_v21  ;;  %v67_v33 = vmul.f32 1.442695, %v53_v24  ;;  %v54_v34 = vld [vmem:[#allocation4 + $0x38] sm:$0xff] }
  0x14   :  { %189 = vpow2.f32 %v83_v11  ;;  %v91_v37 = vmul.f32 1.442695, %v77_v27  ;;  %v78_v41 = vld [vmem:[#allocation7 + $0x38] sm:$0xff]  ;;  %v69_v44 = vmul.f32 1.442695, %v54_v34 }
  0x15   :  { %v180_v25 = vpop.eup %179  ;;  %191 = vpow2.f32 %v61_v15  ;;  %v93_v51 = vmul.f32 1.442695, %v78_v41 }
  0x16   :  { %v182_v28 = vpop.eup %181  ;;  %v96_v29 = vmul.f32 %v180_v25, %v348_v19  ;;  %193 = vpow2.f32 %v85_v16 }
  0x17   :  { %v184_v31 = vpop.eup %183  ;;  %v106_v32 = vmul.f32 %v182_v28, %v350_v22  ;;  %195 = vpow2.f32 %v63_v20 }
  0x18   :  { %v186_v35 = vpop.eup %185  ;;  %v97_v36 = vmul.f32 %v184_v31, %v348_v19  ;;  %197 = vpow2.f32 %v87_v23 }
  0x19   :  { %v188_v38 = vpop.eup %187  ;;  %v114_v39 = vadd.f32 %v106_v32, %v96_v29  ;;  %v107_v40 = vmul.f32 %v186_v35, %v350_v22  ;;  %199 = vpow2.f32 %v65_v26 }
  0x1a   :  { %v190_v42 = vpop.eup %189  ;;  %v98_v43 = vmul.f32 %v188_v38, %v348_v19  ;;  %201 = vpow2.f32 %v89_v30 }
  0x1b   :  { %v192_v45 = vpop.eup %191  ;;  %v122_v46 = vadd.f32 1.1920929e-07, %v114_v39  ;;  %v115_v47 = vadd.f32 %v107_v40, %v97_v36  ;;  %v108_v48 = vmul.f32 %v190_v42, %v350_v22  ;;  %203 = vpow2.f32 %v67_v33 }
  0x1c   :  { %v194_v49 = vpop.eup %193  ;;  %v99_v50 = vmul.f32 %v192_v45, %v348_v19  ;;  %205 = vpow2.f32 %v91_v37 }
  0x1d   :  { %v196_v52 = vpop.eup %195  ;;  %207 = vlog2.f32 %v122_v46  ;;  %v123_v53 = vadd.f32 1.1920929e-07, %v115_v47  ;;  %v116_v54 = vadd.f32 %v108_v48, %v98_v43  ;;  %v109_v55 = vmul.f32 %v194_v49, %v350_v22 }
  0x1e   :  { %v198_v56 = vpop.eup %197  ;;  %v100_v57 = vmul.f32 %v196_v52, %v348_v19  ;;  %209 = vpow2.f32 %v69_v44 }
  0x1f   :  { %v200_v58 = vpop.eup %199  ;;  %211 = vlog2.f32 %v123_v53  ;;  %v124_v59 = vadd.f32 1.1920929e-07, %v116_v54  ;;  %v117_v60 = vadd.f32 %v109_v55, %v99_v50  ;;  %v110_v61 = vmul.f32 %v198_v56, %v350_v22 }
  0x20   :  { %v202_v62 = vpop.eup %201  ;;  %v101_v63 = vmul.f32 %v200_v58, %v348_v19  ;;  %213 = vpow2.f32 %v93_v51 }
  0x21   :  { %v204_v0 = vpop.eup %203  ;;  %215 = vlog2.f32 %v124_v59  ;;  %v125_v1 = vadd.f32 1.1920929e-07, %v117_v60  ;;  %v118_v2 = vadd.f32 %v110_v61, %v100_v57  ;;  %v111_v3 = vmul.f32 %v202_v62, %v350_v22 }
  0x22   :  { %v206_v4 = vpop.eup %205  ;;  %v102_v5 = vmul.f32 %v204_v0, %v348_v19 }
  0x23   :  { %v208_v6 = vpop.eup %207  ;;  %217 = vlog2.f32 %v125_v1  ;;  %v126_v7 = vadd.f32 1.1920929e-07, %v118_v2  ;;  %v119_v8 = vadd.f32 %v111_v3, %v101_v63  ;;  %v112_v9 = vmul.f32 %v206_v4, %v350_v22 }
  0x24   :  { %v210_v10 = vpop.eup %209  ;;  %v131_v11 = vmul.f32 0.6931472, %v208_v6 }
  0x25   :  { %v212_v12 = vpop.eup %211  ;;  %219 = vlog2.f32 %v126_v7  ;;  %v127_v13 = vadd.f32 1.1920929e-07, %v119_v8  ;;  %v120_v14 = vadd.f32 %v112_v9, %v102_v5  ;;  %v103_v15 = vmul.f32 %v210_v10, %v348_v19 }
  0x26   :  { %v214_v16 = vpop.eup %213  ;;  %146 = vst [vmem:[#allocation9] sm:$0xff] %v131_v11  ;;  %v133_v17 = vmul.f32 0.6931472, %v212_v12 }
  0x27   :  { %v216_v18 = vpop.eup %215  ;;  %221 = vlog2.f32 %v127_v13  ;;  %v128_v20 = vadd.f32 1.1920929e-07, %v120_v14  ;;  %v113_v21 = vmul.f32 %v214_v16, %v350_v22 }
  0x28   :  { %147 = vst [vmem:[#allocation9 + $0x8] sm:$0xff] %v133_v17  ;;  %v135_v23 = vmul.f32 0.6931472, %v216_v18 }
  0x29   :  { %v218_v24 = vpop.eup %217  ;;  %223 = vlog2.f32 %v128_v20  ;;  %v121_v25 = vadd.f32 %v113_v21, %v103_v15 }
  0x2a   :  { %148 = vst [vmem:[#allocation9 + $0x10] sm:$0xff] %v135_v23  ;;  %v137_v26 = vmul.f32 0.6931472, %v218_v24 }
  0x2b   :  { %v220_v27 = vpop.eup %219  ;;  %v129_v28 = vadd.f32 1.1920929e-07, %v121_v25 }
  0x2c   :  { %149 = vst [vmem:[#allocation9 + $0x18] sm:$0xff] %v137_v26  ;;  %v139_v29 = vmul.f32 0.6931472, %v220_v27 }
  0x2d   :  { %v222_v19 = vpop.eup %221  ;;  %225 = vlog2.f32 %v129_v28 }
  0x2e   :  { %150 = vst [vmem:[#allocation9 + $0x20] sm:$0xff] %v139_v29  ;;  %v141_v30 = vmul.f32 0.6931472, %v222_v19 }
  0x2f   :  { %v224_v31 = vpop.eup %223 }
  0x30   :  { %151 = vst [vmem:[#allocation9 + $0x28] sm:$0xff] %v141_v30  ;;  %v143_v32 = vmul.f32 0.6931472, %v224_v31 }
  0x32   :  { %152 = vst [vmem:[#allocation9 + $0x30] sm:$0xff] %v143_v32 }
  0x33   :  { %v226_v22 = vpop.eup %225 }
  0x34   :  { %v145_v33 = vmul.f32 0.6931472, %v226_v22 }
  0x36   :  { %153 = vst [vmem:[#allocation9 + $0x38] sm:$0xff] %v145_v33 }
  0x37   :  { %166 = dma.vmem_to_hbm [thread:$0]  %s159_s27, 1024, %s161_s30, [#allocation6], %s306_s20, %s306_s20, %s307_s21  }
  0x38   :  { %303 = dma.done.wait [#allocation6], 1024  }
  0x39   :  { %304 = vsyncadd [#allocation6], 4294966272 }
  0x3a   :  { %171 = vsyncpa [#allocation5], 1 }
  0x3b   :  { %172 = vsyncpa [#allocation8], 1 }
  0x3c   :  { %173 = vsyncpa [#allocation6], 1 }

</bundles_post_ra>
